<compile_context>
chip_gen: v6e
topology: v6e:2x2x1
jax: 0.10.0
libtpu: 0.0.40
codegen_flags: <defaults>
</compile_context>

<pallas_src>
import functools

import numpy as np

import jax
import jax.numpy as jnp
from jax.experimental import pallas as pl
from jax.experimental.pallas import tpu as pltpu


# ----------------------------------------------------------------------------
# Parameter init identical to AnchorOp.__init__ (init_weights=True, groups=1).
# ----------------------------------------------------------------------------
def make_anchor_params(scaling_factor: int, in_channels: int, kernel_size: int = 1):
    r2 = scaling_factor ** 2
    out_channels = in_channels * r2
    weight = np.zeros((out_channels, in_channels, kernel_size, kernel_size),
                      dtype=np.float32)
    for ii in range(in_channels):
        weight[ii * r2:(ii + 1) * r2, ii, kernel_size // 2, kernel_size // 2] = 1.0
    bias = np.zeros((out_channels,), dtype=np.float32)
    return jnp.asarray(weight), jnp.asarray(bias)


# ----------------------------------------------------------------------------
# Kernels.
# ----------------------------------------------------------------------------
def _anchor_repeat_kernel(x_ref, o_ref, *, r2, chunk):
    # x_ref: (1, C_in, t_pix), o_ref: (1, C_out, t_pix) with C_out = C_in * r2.
    # Pure channel repeat-interleave, done per pixel chunk so vreg pressure is
    # bounded by (r2, chunk) no matter how big the pixel tile is.
    _, c_in, t_pix = x_ref.shape

    def emit(off, size):
        for c in range(c_in):
            row = x_ref[0, pl.ds(c, 1), pl.ds(off, size)]            # (1, size)
            rep = jnp.broadcast_to(row, (r2, size))                  # sublane bcast
            o_ref[0, pl.ds(c * r2, r2), pl.ds(off, size)] = rep.astype(o_ref.dtype)

    n_full = t_pix // chunk
    rem = t_pix - n_full * chunk
    if n_full > 0:
        @pl.loop(0, n_full)
        def _(i):
            emit(pl.multiple_of(i * chunk, chunk), chunk)
    if rem > 0:
        emit(n_full * chunk, rem)


def _anchor_conv1x1_kernel(x_ref, w_ref, b_ref, o_ref, *, chunk):
    # General 1x1 conv: per-pixel matmul, pixels on lanes, weights resident.
    # x_ref: (1, C_in, t_pix), w_ref: (C_out, C_in), b_ref: (C_out, 1).
    _, c_in, t_pix = x_ref.shape
    w = w_ref[...]        # small, hoisted out of the chunk loop
    b = b_ref[...]

    def emit(off, size):
        xs = x_ref[0, :, pl.ds(off, size)]                           # (C_in, size)
        acc = jnp.dot(w, xs, preferred_element_type=jnp.float32)
        o_ref[0, :, pl.ds(off, size)] = (acc + b).astype(o_ref.dtype)

    n_full = t_pix // chunk
    rem = t_pix - n_full * chunk
    if n_full > 0:
        @pl.loop(0, n_full)
        def _(i):
            emit(pl.multiple_of(i * chunk, chunk), chunk)
    if rem > 0:
        emit(n_full * chunk, rem)


# ----------------------------------------------------------------------------
# Tiling helpers.
# ----------------------------------------------------------------------------
def _round_down(x: int, m: int) -> int:
    return (x // m) * m


def _round_up(x: int, m: int) -> int:
    return ((x + m - 1) // m) * m


def _choose_pixel_tile(hw: int, cap: int) -> int:
    """Pick a lane-dense pixel tile.

    Full extent if it fits; otherwise prefer an exact divisor (no masked tail)
    only when it is >= cap/2 — a small exact divisor would multiply grid steps
    (and the ~0.35us/step overhead) for zero benefit.  Falling back to `cap`
    relies on Pallas masking the ragged tail block: OOB output writes are
    masked, and OOB garbage reads only ever feed masked output columns (the op
    is element-wise / channel-contracting per pixel, never a pixel reduction).
    """
    if hw <= cap:
        return hw                       # full-extent block: always legal
    t = _round_down(cap, 256)
    while t >= max(256, cap // 2):
        if hw % t == 0:
            return t
        t -= 256
    return cap


# ----------------------------------------------------------------------------
# Wrapper.
# ----------------------------------------------------------------------------
def anchor_op_forward(x_nchw, weight, bias, *, is_anchor_init=None,
                      max_pix_tile=None, force_matmul: bool = False):
    """AnchorOp forward (1x1 conv). x: (N, C_in, H, W), weight: (C_out, C_in, 1, 1),
    bias: (C_out,). Returns (N, C_out, H, W)."""
    N, C_in, H, W = x_nchw.shape
    C_out, C_in_w, kh, kw = weight.shape
    # TODO(synk): kernel_size > 1 / groups > 1 Conv2d variants not implemented
    # (module default for AnchorOp is the 1x1, groups=1 anchor conv).
    assert kh == 1 and kw == 1, "kernel implemented for kernel_size=1"
    assert C_in_w == C_in, "kernel implemented for groups=1"

    HW = H * W
    itemsize = jnp.dtype(x_nchw.dtype).itemsize

    # Contiguous (free) reshape: NCHW -> (N, C, H*W).  Pixels land on lanes.
    x3 = x_nchw.reshape(N, C_in, HW)
    w_mat = weight.reshape(C_out, C_in)
    b_mat = bias.reshape(C_out, 1)

    r2 = C_out // C_in if (C_in > 0 and C_out % C_in == 0) else 0

    # --- static fast-path decision (host side; never traces / never syncs a tracer)
    if force_matmul:
        is_anchor_init = False
    if is_anchor_init is None:
        is_anchor_init = False
        if r2 > 0:
            try:
                w_np = np.asarray(jax.device_get(weight)).reshape(C_out, C_in)
                b_np = np.asarray(jax.device_get(bias))
                expected = (np.arange(C_out)[:, None] // r2
                            == np.arange(C_in)[None, :]).astype(w_np.dtype)
                is_anchor_init = bool(np.array_equal(w_np, expected)
                                      and not np.any(b_np))
            except Exception:
                # Traced weights (under jit) -> cannot inspect; use matmul path.
                is_anchor_init = False
    use_fast = bool(is_anchor_init) and r2 > 0

    # --- generation-aware VMEM budget and pixel-tile sizing
    try:
        vmem_cap = int(pltpu.get_tpu_info().vmem_capacity_bytes)
    except Exception:
        vmem_cap = 64 * 1024 * 1024                 # conservative (v7x-sized)
    # ~48 MiB of tile budget on 128-MiB-VMEM chips (v5e/v6e), ~24 MiB on v7x.
    budget = max(8 << 20, min(48 << 20, vmem_cap // 2 - (8 << 20)))
    per_pix = 2 * (C_in + C_out) * itemsize          # double-buffered in+out / pixel
    cap = max(256, _round_down(budget // per_pix, 256))
    if max_pix_tile is not None:
        cap = max(256, min(cap, _round_down(int(max_pix_tile), 256)))
    t_pix = _choose_pixel_tile(HW, cap)
    grid_pix = pl.cdiv(HW, t_pix)

    # v7x has 2 TensorCores: guarantee >=2 parallel grid cells for single-image
    # inputs (costs one extra ~0.35us step on v5e/v6e, recovers ~2x on v7x).
    if N * grid_pix == 1 and HW >= 256:
        t_pix = _round_up(pl.cdiv(HW, 2), 128)
        grid_pix = pl.cdiv(HW, t_pix)
    grid = (N, grid_pix)

    # In-kernel pixel chunk: bounds vreg pressure independently of tile size.
    chunk = max(256, min(2048,
                         _round_down((64 * 1024) // max(1, C_out * itemsize), 128)))

    # Scoped VMEM limit derived from the actual double-buffered footprint.
    footprint = per_pix * t_pix + (C_out * C_in + C_out) * 4
    vmem_limit = int(min(vmem_cap, max(32 << 20, footprint + (4 << 20))))

    compiler_params = pltpu.CompilerParams(
        dimension_semantics=("parallel", "parallel"),
        vmem_limit_bytes=vmem_limit)

    in_bytes = N * C_in * HW * itemsize
    out_bytes = N * C_out * HW * itemsize

    x_spec = pl.BlockSpec((1, C_in, t_pix), lambda n, p: (n, 0, p))
    o_spec = pl.BlockSpec((1, C_out, t_pix), lambda n, p: (n, 0, p))
    out_shape = jax.ShapeDtypeStruct((N, C_out, HW), x_nchw.dtype)

    if use_fast:
        cost = pl.CostEstimate(flops=0, transcendentals=0,
                               bytes_accessed=in_bytes + out_bytes)
        out3 = pl.pallas_call(
            functools.partial(_anchor_repeat_kernel, r2=r2, chunk=chunk),
            out_shape=out_shape,
            grid_spec=pltpu.PrefetchScalarGridSpec(
                num_scalar_prefetch=0, grid=grid,
                in_specs=[x_spec], out_specs=o_spec),
            compiler_params=compiler_params,
            cost_estimate=cost,
        )(x3)
    else:
        cost = pl.CostEstimate(flops=2 * N * HW * C_in * C_out, transcendentals=0,
                               bytes_accessed=in_bytes + out_bytes)
        out3 = pl.pallas_call(
            functools.partial(_anchor_conv1x1_kernel, chunk=chunk),
            out_shape=out_shape,
            grid_spec=pltpu.PrefetchScalarGridSpec(
                num_scalar_prefetch=0, grid=grid,
                in_specs=[
                    x_spec,
                    pl.BlockSpec((C_out, C_in), lambda n, p: (0, 0)),  # resident weights
                    pl.BlockSpec((C_out, 1), lambda n, p: (0, 0)),     # resident bias
                ],
                out_specs=o_spec),
            compiler_params=compiler_params,
            cost_estimate=cost,
        )(x3, w_mat, b_mat)

    # Contiguous (free) reshape back: (N, C_out, H*W) -> NCHW.
    return out3.reshape(N, C_out, H, W)


# ----------------------------------------------------------------------------
# Self-test.
# ----------------------------------------------------------------------------
if __name__ == "__main__":
    scaling_factor = 2
    in_channels = 3
    N, H, W = 2, 16, 16
    r2 = scaling_factor ** 2
    C_out = in_channels * r2

    key = jax.random.PRNGKey(0)
    kx, kw, kb = jax.random.split(key, 3)
    x = jax.random.normal(kx, (N, in_channels, H, W), dtype=jnp.float32)

    # 1) Default AnchorOp weights -> fast (no-matmul) channel-repeat path.
    weight, bias = make_anchor_params(scaling_factor, in_channels)
    out = jax.block_until_ready(anchor_op_forward(x, weight, bias))
    ref = jnp.repeat(x, r2, axis=1)
    assert out.shape == (N, C_out, H, W)
    assert jnp.allclose(out, ref, atol=1e-5), "fast path mismatch vs repeat-interleave"

    # 2) Arbitrary (e.g. trained / perturbed) 1x1-conv weights -> matmul fallback.
    w_rand = jax.random.normal(kw, (C_out, in_channels, 1, 1), dtype=jnp.float32)
    b_rand = jax.random.normal(kb, (C_out,), dtype=jnp.float32)
    out2 = jax.block_until_ready(anchor_op_forward(x, w_rand, b_rand))
    ref2 = (jnp.einsum("oc,nchw->nohw", w_rand.reshape(C_out, in_channels), x)
            + b_rand[None, :, None, None])
    assert jnp.allclose(out2, ref2, atol=1e-4, rtol=1e-4), "matmul path mismatch vs einsum"

    print("KERNEL_OK")
</pallas_src>

<mosaic_0001>
module attributes {stable_mosaic.version = 11 : i64} {
  func.func @_anchor_repeat_kernel(%arg0: i32, %arg1: i32, %arg2: memref<1x3x256xf32, #tpu.memory_space<vmem>>, %arg3: memref<1x12x256xf32, #tpu.memory_space<vmem>>) attributes {dimension_semantics = [#tpu.dimension_semantics<parallel>, #tpu.dimension_semantics<parallel>], iteration_bounds = array<i64: 2, 1>, scalar_prefetch = 0 : i64, scratch_operands = 0 : i64, tpu.core_type = #tpu.core_type<tc>, window_params = [{transform_indices = @transform_0, window_bounds = array<i64: 1, 3, 256>}, {transform_indices = @transform_1, window_bounds = array<i64: 1, 12, 256>}]} {
    %c0 = arith.constant 0 : index
    %c0_0 = arith.constant 0 : index
    %c0_1 = arith.constant 0 : index
    %0 = vector.load %arg2[%c0, %c0_0, %c0_1] : memref<1x3x256xf32, #tpu.memory_space<vmem>>, vector<1x1x256xf32>
    %1 = vector.shape_cast %0 : vector<1x1x256xf32> to vector<1x256xf32>
    %2 = vector.shape_cast %1 : vector<1x256xf32> to vector<1x256xf32>
    %3 = vector.broadcast %2 : vector<1x256xf32> to vector<4x256xf32>
    %c0_2 = arith.constant 0 : index
    %c0_3 = arith.constant 0 : index
    %c0_4 = arith.constant 0 : index
    %4 = vector.load %arg3[%c0_2, %c0_3, %c0_4] : memref<1x12x256xf32, #tpu.memory_space<vmem>>, vector<1x4x256xf32>
    %5 = vector.shape_cast %4 : vector<1x4x256xf32> to vector<4x256xf32>
    %6 = vector.shape_cast %3 : vector<4x256xf32> to vector<1x4x256xf32>
    tpu.vector_store %arg3[%c0_2, %c0_3, %c0_4], %6 {strides = array<i32>} : memref<1x12x256xf32, #tpu.memory_space<vmem>>, vector<1x4x256xf32>,
    %c0_5 = arith.constant 0 : index
    %c1 = arith.constant 1 : index
    %c0_6 = arith.constant 0 : index
    %7 = vector.load %arg2[%c0_5, %c1, %c0_6] : memref<1x3x256xf32, #tpu.memory_space<vmem>>, vector<1x1x256xf32>
    %8 = vector.shape_cast %7 : vector<1x1x256xf32> to vector<1x256xf32>
    %9 = vector.shape_cast %8 : vector<1x256xf32> to vector<1x256xf32>
    %10 = vector.broadcast %9 : vector<1x256xf32> to vector<4x256xf32>
    %c0_7 = arith.constant 0 : index
    %c4 = arith.constant 4 : index
    %c0_8 = arith.constant 0 : index
    %11 = vector.load %arg3[%c0_7, %c4, %c0_8] : memref<1x12x256xf32, #tpu.memory_space<vmem>>, vector<1x4x256xf32>
    %12 = vector.shape_cast %11 : vector<1x4x256xf32> to vector<4x256xf32>
    %13 = vector.shape_cast %10 : vector<4x256xf32> to vector<1x4x256xf32>
    tpu.vector_store %arg3[%c0_7, %c4, %c0_8], %13 {strides = array<i32>} : memref<1x12x256xf32, #tpu.memory_space<vmem>>, vector<1x4x256xf32>,
    %c0_9 = arith.constant 0 : index
    %c2 = arith.constant 2 : index
    %c0_10 = arith.constant 0 : index
    %14 = vector.load %arg2[%c0_9, %c2, %c0_10] : memref<1x3x256xf32, #tpu.memory_space<vmem>>, vector<1x1x256xf32>
    %15 = vector.shape_cast %14 : vector<1x1x256xf32> to vector<1x256xf32>
    %16 = vector.shape_cast %15 : vector<1x256xf32> to vector<1x256xf32>
    %17 = vector.broadcast %16 : vector<1x256xf32> to vector<4x256xf32>
    %c0_11 = arith.constant 0 : index
    %c8 = arith.constant 8 : index
    %c0_12 = arith.constant 0 : index
    %18 = vector.load %arg3[%c0_11, %c8, %c0_12] : memref<1x12x256xf32, #tpu.memory_space<vmem>>, vector<1x4x256xf32>
    %19 = vector.shape_cast %18 : vector<1x4x256xf32> to vector<4x256xf32>
    %20 = vector.shape_cast %17 : vector<4x256xf32> to vector<1x4x256xf32>
    tpu.vector_store %arg3[%c0_11, %c8, %c0_12], %20 {strides = array<i32>} : memref<1x12x256xf32, #tpu.memory_space<vmem>>, vector<1x4x256xf32>,
    return
  }
  func.func @transform_0(%arg0: i32, %arg1: i32) -> (i32, i32, i32) {
    %c0_i32 = arith.constant 0 : i32
    %c0_i32_0 = arith.constant 0 : i32
    return %arg0, %c0_i32, %arg1 : i32, i32, i32
  }
  func.func @transform_1(%arg0: i32, %arg1: i32) -> (i32, i32, i32) {
    %c0_i32 = arith.constant 0 : i32
    %c0_i32_0 = arith.constant 0 : i32
    return %arg0, %c0_i32, %arg1 : i32, i32, i32
  }
}

</mosaic_0001>

<bundles_post_ra>
// kernel: tpu_custom_call.1
= control target key start
LH: loop header
LB: loop body
LE: loop exit
PB: predicated region body
PF: predicated region fallthrough
CT: control target
= control target key end

     0   :  { %s360_s6 = smov 0   ;;  %s362_s7 = smov 0   ;;  %s393_s0 = inlined_call_operand.vmem [shape: f32[2,3,256], index: 0, kind: input, shape index: {}]   ;;  %s394_s1 = inlined_call_operand.vmem [shape: f32[2,12,256], index: 1, kind: output, shape index: {}]  }
   0x1   :  { %s364_s8 = smov 0  }
   0x2 LB: > { %s23_s9 = sadd.s32 1, %s344_s7  ;;  %p291_p0 = scmp.ge.s32.totalorder %s348_s8, 1  ;;  %s348_s8 = sphi %s364_s8, %s11_s8   ;;  %s344_s7 = sphi %s362_s7, %s396_s7   ;;  %s340_s6 = sphi %s360_s6, %s395_s6  }
   0x3   : > { %p25_p1 = scmp.ge.s32.totalorder %s23_s9, 2  ;;  %p108_p2 = scmp.lt.s32.totalorder %s348_s8, 3 }
   0x5   : > { %s398_s9 = smov (%p25_p1, %s23_s9), 0  ;;  %p109_p3 = pnand %p291_p0, %p108_p2 }
   0x6   : > { %p137_p4 = scmp.lt.s32.totalorder (!%p109_p3), %s340_s6, 1 }
   0x7   : > { %112 = sbr.rel (%p109_p3) target bundleno = 23 (0x17), region = 24 }
   0xc   : > { %v158_v0 = vlaneseq  ;;  %s400_s6 = smov (!%p137_p4, %s340_s6), 1 }
   0xd   : > { %s300_s10 = sshll.u32 %s400_s6, 3  ;;  %s301_s11 = sshll.u32 %s400_s6, 5 }
   0xe   : > { %v159_v1 = vshrl.u32 %v158_v0, 7  ;;  %s144_s14 = scalar_lea.vmem %s393_s0, %s300_s10  ;;  %s154_s17 = scalar_lea.vmem %s394_s1, %s301_s11 }
   0xf   : > { %v156_v4 = vld [vmem:[%s144_s14] ss:$4 sm:$0x3]  ;;  %v296_v5 = vld [vmem:[%s144_s14 + $0x1] ss:$4 sm:$0x3] }
  0x10   : > { %v160_v2 = vsub.s32 0, %v159_v1  ;;  %v164_v3 = vsub.s32 1, %v159_v1  ;;  %v297_v10 = vld [vmem:[%s144_s14 + $0x2] ss:$4 sm:$0x3] }
  0x12   : > { %v161_v6 = vrot.slane %v156_v4, %v160_v2  ;;  %v165_v7 = vrot.slane %v156_v4, %v164_v3  ;;  %v176_v8 = vrot.slane %v296_v5, %v160_v2  ;;  %v180_v9 = vrot.slane %v296_v5, %v164_v3 }
  0x13   : > { %v191_v11 = vrot.slane %v297_v10, %v160_v2  ;;  %v195_v12 = vrot.slane %v297_v10, %v164_v3 }
  0x14   : > { %168 = vst [vmem:[%s154_s17] sm:$0xf] %v161_v6  ;;  %169 = vst [vmem:[%s154_s17 + $0x8] sm:$0xf] %v165_v7 }
  0x15   : > { %183 = vst [vmem:[%s154_s17] sm:$0xf0] %v176_v8  ;;  %184 = vst [vmem:[%s154_s17 + $0x8] sm:$0xf0] %v180_v9 }
  0x16   : > { %198 = vst [vmem:[%s154_s17 + $0x10] sm:$0xf] %v191_v11  ;;  %199 = vst [vmem:[%s154_s17 + $0x18] sm:$0xf] %v195_v12 }
  0x17 PF: > { %s11_s8 = sadd.s32 1, %s348_s8   ;;  %s395_s6 = smov %s344_s7 }
  0x18   : > { %p8_p5 = scmp.ge.s32.totalorder %s11_s8, 4   ;;  %s396_s7 = smov %s398_s9 }
  0x1a   :  { %10 = sbr.rel (!%p8_p5) target bundleno = 2 (0x2), region = 56 }

</bundles_post_ra>
